<compile_context>
chip_gen: v6e
topology: v6e:2x2x1
jax: 0.10.0
libtpu: 0.0.40
codegen_flags: <defaults>
</compile_context>

<pallas_src>
import functools

import jax
import jax.numpy as jnp
from jax.experimental import pallas as pl
from jax.experimental.pallas import tpu as pltpu

LANE = 128      # weight feature-dim padding multiple (128 fills v5e's MXU;
                # round toward 256 when true hidden dims exceed 128 on v6e/v7x)
SUBLANE = 8
BN_EPS = 1e-5
DEFAULT_TILE_N = 256   # batch tile for the no-BN pipelined path (>= 256 rows
                       # keeps the 256x256 MXUs of v6e/v7x well occupied)

_VMEM = pl.BlockSpec(memory_space=pltpu.MemorySpace.VMEM)


def _round_up(x, m):
    return (x + m - 1) // m * m


@functools.lru_cache(maxsize=1)
def _vmem_limit_bytes():
    """Per-generation VMEM budget: ~3/4 of physical (96 MiB v5e/v6e, 48 MiB v7x)."""
    try:
        info = pltpu.get_tpu_info()
        cap = getattr(info, "vmem_capacity_bytes", None)
        if cap:
            return min(int(cap) * 3 // 4, 100 * 1024 * 1024)
    except Exception:
        pass
    return 48 * 1024 * 1024   # conservative fallback (safe on v7x too)


# ---------------------------------------------------------------------------
# Kernel factories
# ---------------------------------------------------------------------------
def make_resident_mlp_kernel(num_layers, relu_first, eps=BN_EPS,
                             matmul_dtype=jnp.bfloat16):
    """Whole-batch-resident fused kernel (batch_norm=True needs full-batch stats).

    refs = [x, wt0, b0, (gamma0, beta0, wt1, b1), ..., out]
    """

    def kernel(*refs):
        x_ref, o_ref = refs[0], refs[-1]
        inv_n = 1.0 / float(x_ref.shape[0])

        def linear(v_low, wt_ref, b_ref):
            # bf16 MXU inputs, f32 accumulation; bias add in f32.
            acc = jnp.dot(v_low, wt_ref[...], preferred_element_type=jnp.float32)
            return acc + b_ref[...]

        def batch_norm(v, gamma_ref, beta_ref):
            # Two-pass (mean, then centered sum-of-squares) -> no E[x^2]-E[x]^2
            # cancellation.  All stats math stays in f32; rsqrt goes to the EUP.
            mean = jnp.sum(v, axis=0, keepdims=True) * inv_n
            d = v - mean
            var = jnp.sum(d * d, axis=0, keepdims=True) * inv_n   # biased var
            scale = gamma_ref[...] * jax.lax.rsqrt(var + eps)
            return d * scale + beta_ref[...]

        x = linear(x_ref[...].astype(matmul_dtype), refs[1], refs[2])
        idx = 3
        for _ in range(1, num_layers):
            gamma_ref, beta_ref, wt_ref, b_ref = refs[idx:idx + 4]
            idx += 4
            if relu_first:
                x = batch_norm(jnp.maximum(x, 0.0), gamma_ref, beta_ref)
            else:
                x = jnp.maximum(batch_norm(x, gamma_ref, beta_ref), 0.0)
            # dropout (p=0.0) -> identity
            x = linear(x.astype(matmul_dtype), wt_ref, b_ref)   # bf16 carry

        o_ref[...] = x.astype(o_ref.dtype)

    return kernel


def make_tiled_mlp_kernel(num_layers, matmul_dtype=jnp.bfloat16):
    """Batch-tiled pipelined kernel (batch_norm=False -> norms are Identity, so
    the inter-layer op is just ReLU; relu_first has no effect with Identity).

    refs = [x_tile, wt0, b0, wt1, b1, ..., out_tile]
    """

    def kernel(*refs):
        x_ref, o_ref = refs[0], refs[-1]
        x = jnp.dot(x_ref[...].astype(matmul_dtype), refs[1][...],
                    preferred_element_type=jnp.float32) + refs[2][...]
        idx = 3
        for _ in range(1, num_layers):
            wt_ref, b_ref = refs[idx], refs[idx + 1]
            idx += 2
            x = jnp.maximum(x, 0.0).astype(matmul_dtype)     # bf16 carry
            # dropout (p=0.0) -> identity
            x = jnp.dot(x, wt_ref[...],
                        preferred_element_type=jnp.float32) + b_ref[...]
        o_ref[...] = x.astype(o_ref.dtype)

    return kernel


# ---------------------------------------------------------------------------
# Wrapper
# ---------------------------------------------------------------------------
@functools.partial(jax.jit,
                   static_argnames=("batch_norm", "relu_first", "tile_n"))
def mlp_forward(x, kernel_params, *, batch_norm=True, relu_first=False,
                tile_n=DEFAULT_TILE_N):
    """x: [N, F_in] float32 (no padding/slicing done here).
    kernel_params: list of per-layer dicts (wt bf16 [K, N_pad], b/gamma/beta f32)."""
    n, f_in = x.shape
    num_layers = len(kernel_params)
    out_features = kernel_params[-1]["wt"].shape[1]

    # Advisory cost estimate for XLA's scheduler.
    flops = 0
    bytes_accessed = int(x.size) * 4 + int(n) * int(out_features) * 4
    for p in kernel_params:
        k, m = p["wt"].shape
        flops += 2 * n * k * m
        bytes_accessed += int(p["wt"].size) * p["wt"].dtype.itemsize
        bytes_accessed += int(p["b"].size) * 4
    cost = pl.CostEstimate(flops=int(flops), transcendentals=0,
                           bytes_accessed=int(bytes_accessed))

    vmem_limit = _vmem_limit_bytes()
    use_bn = batch_norm and num_layers > 1

    if use_bn:
        # --- BatchNorm path: whole batch resident in VMEM (BN needs batch stats)
        flat = [x, kernel_params[0]["wt"], kernel_params[0]["b"]]
        for i in range(1, num_layers):
            prev, cur = kernel_params[i - 1], kernel_params[i]
            flat += [prev["gamma"], prev["beta"], cur["wt"], cur["b"]]
        kernel = make_resident_mlp_kernel(num_layers, relu_first)
        return pl.pallas_call(
            kernel,
            out_shape=jax.ShapeDtypeStruct((n, out_features), jnp.float32),
            in_specs=[_VMEM] * len(flat),
            out_specs=_VMEM,
            compiler_params=pltpu.CompilerParams(vmem_limit_bytes=vmem_limit),
            cost_estimate=cost,
        )(*flat)

    # --- No-BN path: batch grid, pipelined, weights resident, megacore-parallel
    tn = min(tile_n, _round_up(n, SUBLANE))
    grid = (pl.cdiv(n, tn),)

    flat = [x]
    in_specs = [pl.BlockSpec((tn, f_in), lambda i: (i, 0))]
    for p in kernel_params:
        flat += [p["wt"], p["b"]]
        in_specs += [pl.BlockSpec(p["wt"].shape, lambda i: (0, 0)),
                     pl.BlockSpec(p["b"].shape, lambda i: (0, 0))]
    kernel = make_tiled_mlp_kernel(num_layers)
    return pl.pallas_call(
        kernel,
        out_shape=jax.ShapeDtypeStruct((n, out_features), jnp.float32),
        grid=grid,
        in_specs=in_specs,
        out_specs=pl.BlockSpec((tn, out_features), lambda i: (i, 0)),
        compiler_params=pltpu.CompilerParams(
            dimension_semantics=("parallel",),   # shards tiles across v7x's 2 TCs
            vmem_limit_bytes=vmem_limit),
        cost_estimate=cost,
    )(*flat)


# ---------------------------------------------------------------------------
# Parameter construction (deterministic, PyTorch-style uniform init).
# Weights stored pre-transposed [K, N]; intermediate N dims padded to LANE
# multiples (bf16 MXU inputs), first K and final N left unpadded so x / out
# need no wrapper-side pad or slice.
# ---------------------------------------------------------------------------
def init_mlp_params(key, channel_list, *, matmul_dtype=jnp.bfloat16, lane=LANE):
    kernel_params, ref_params = [], []
    num_layers = len(channel_list) - 1
    in_pad = channel_list[0]          # first K unpadded (matches unpadded x)
    for li, (in_c, out_c) in enumerate(zip(channel_list[:-1], channel_list[1:])):
        key, kw, kb = jax.random.split(key, 3)
        bound = 1.0 / (in_c ** 0.5)
        w = jax.random.uniform(kw, (in_c, out_c), jnp.float32, -bound, bound)
        b = jax.random.uniform(kb, (out_c,), jnp.float32, -bound, bound)
        gamma = jnp.ones((out_c,), jnp.float32)
        beta = jnp.zeros((out_c,), jnp.float32)
        ref_params.append(dict(wt=w, b=b, gamma=gamma, beta=beta))

        last = (li == num_layers - 1)
        out_pad = out_c if last else _round_up(out_c, lane)
        wt_pad = jnp.zeros((in_pad, out_pad), jnp.float32).at[:in_c, :out_c].set(w)
        kernel_params.append(dict(
            wt=wt_pad.astype(matmul_dtype),                                    # bf16
            b=jnp.zeros((1, out_pad), jnp.float32).at[0, :out_c].set(b),       # f32
            gamma=jnp.zeros((1, out_pad), jnp.float32).at[0, :out_c].set(gamma),
            beta=jnp.zeros((1, out_pad), jnp.float32).at[0, :out_c].set(beta),
        ))
        in_pad = out_pad
    return kernel_params, ref_params


# ---------------------------------------------------------------------------
# Pure-JAX reference. matmul_dtype=None -> exact f32 PyTorch semantics;
# matmul_dtype=bf16 -> emulates the kernel's matmul-input rounding.
# ---------------------------------------------------------------------------
def mlp_reference(x, ref_params, *, batch_norm=True, relu_first=False,
                  eps=BN_EPS, matmul_dtype=None):
    def mm(v, w, b):
        if matmul_dtype is not None:
            v = v.astype(matmul_dtype).astype(jnp.float32)
            w = w.astype(matmul_dtype).astype(jnp.float32)
        return v @ w + b

    x = mm(x, ref_params[0]["wt"], ref_params[0]["b"])
    for i in range(1, len(ref_params)):
        prev, cur = ref_params[i - 1], ref_params[i]

        def bn(v):
            m = jnp.mean(v, axis=0, keepdims=True)
            var = jnp.mean((v - m) ** 2, axis=0, keepdims=True)
            return (v - m) / jnp.sqrt(var + eps) * prev["gamma"] + prev["beta"]

        if relu_first:
            x = jnp.maximum(x, 0.0)
            if batch_norm:
                x = bn(x)
        else:
            if batch_norm:
                x = bn(x)
            x = jnp.maximum(x, 0.0)
        x = mm(x, cur["wt"], cur["b"])
    return x


if __name__ == "__main__":
    channel_list = [16, 32, 8]   # in -> hidden -> out

    key = jax.random.PRNGKey(0)
    kx, kp = jax.random.split(key)
    kernel_params, ref_params = init_mlp_params(kp, channel_list)

    configs = [
        (8, True, False),     # module defaults: batch_norm=True, relu_first=False
        (8, True, True),
        (8, False, False),    # no-BN -> batch-tiled pipelined path
        (5, True, False),     # batch not a multiple of 8 (BN resident path)
        (5, False, False),    # batch not a multiple of 8 (edge tile on grid path)
        (300, False, False),  # multi-tile grid (tile=256): pipelining / megacore
        (300, True, False),   # larger batch, BN-resident path
    ]
    for batch, bn, rf in configs:
        x = jax.random.normal(jax.random.fold_in(kx, batch),
                              (batch, channel_list[0]), jnp.float32)
        out = mlp_forward(x, kernel_params, batch_norm=bn, relu_first=rf)
        out = jax.block_until_ready(out)
        assert out.shape == (batch, channel_list[-1])

        # (a) numerics-matched reference (bf16 matmul inputs) -> tight tolerance
        ref_matched = mlp_reference(x, ref_params, batch_norm=bn,
                                    relu_first=rf, matmul_dtype=jnp.bfloat16)
        assert jnp.allclose(out, ref_matched, atol=2e-3, rtol=2e-3), \
            f"matched-ref mismatch at config {(batch, bn, rf)}"

        # (b) pure-f32 PyTorch-semantics reference -> bf16-appropriate tolerance
        ref_f32 = mlp_reference(x, ref_params, batch_norm=bn, relu_first=rf)
        assert jnp.allclose(out, ref_f32, atol=5e-2, rtol=5e-2), \
            f"f32-ref mismatch at config {(batch, bn, rf)}"

    print("KERNEL_OK")
</pallas_src>

<mosaic_0001>
module attributes {stable_mosaic.version = 11 : i64} {
  func.func @kernel(%arg0: memref<8x16xf32, #tpu.memory_space<vmem>>, %arg1: memref<16x128xbf16, #tpu.memory_space<vmem>>, %arg2: memref<1x128xf32, #tpu.memory_space<vmem>>, %arg3: memref<1x128xf32, #tpu.memory_space<vmem>>, %arg4: memref<1x128xf32, #tpu.memory_space<vmem>>, %arg5: memref<128x8xbf16, #tpu.memory_space<vmem>>, %arg6: memref<1x8xf32, #tpu.memory_space<vmem>>, %arg7: memref<8x8xf32, #tpu.memory_space<vmem>>) attributes {dimension_semantics = [], scalar_prefetch = 0 : i64, scratch_operands = 0 : i64, tpu.core_type = #tpu.core_type<tc>} {
    %c0 = arith.constant 0 : index
    %c0_0 = arith.constant 0 : index
    %0 = vector.load %arg0[%c0, %c0_0] : memref<8x16xf32, #tpu.memory_space<vmem>>, vector<8x16xf32>
    %1 = arith.truncf %0 : vector<8x16xf32> to vector<8x16xbf16>
    %c0_1 = arith.constant 0 : index
    %c0_2 = arith.constant 0 : index
    %2 = vector.load %arg1[%c0_1, %c0_2] : memref<16x128xbf16, #tpu.memory_space<vmem>>, vector<16x128xbf16>
    %cst = arith.constant dense<0.000000e+00> : vector<8x128xf32>
    %3 = tpu.matmul %1, %2, %cst {dimension_numbers = #tpu.dot_dimension_numbers<[1], [0], [0], [1], [0, 0, 1, 1], [], []>} : vector<8x16xbf16>, vector<16x128xbf16>, vector<8x128xf32> -> vector<8x128xf32>
    %c0_3 = arith.constant 0 : index
    %c0_4 = arith.constant 0 : index
    %4 = vector.load %arg2[%c0_3, %c0_4] : memref<1x128xf32, #tpu.memory_space<vmem>>, vector<1x128xf32>
    %5 = vector.broadcast %4 : vector<1x128xf32> to vector<8x128xf32>
    %6 = arith.addf %3, %5 : vector<8x128xf32>
    %cst_5 = arith.constant dense<0.000000e+00> : vector<128xf32>
    %7 = vector.multi_reduction <add>, %6, %cst_5 [0] : vector<8x128xf32> to vector<128xf32>
    %8 = vector.shape_cast %7 : vector<128xf32> to vector<1x128xf32>
    %cst_6 = arith.constant 1.250000e-01 : f32
    %9 = vector.broadcast %cst_6 : f32 to vector<1x128xf32>
    %10 = arith.mulf %8, %9 : vector<1x128xf32>
    %11 = vector.broadcast %10 : vector<1x128xf32> to vector<8x128xf32>
    %12 = arith.subf %6, %11 : vector<8x128xf32>
    %13 = arith.mulf %12, %12 : vector<8x128xf32>
    %cst_7 = arith.constant dense<0.000000e+00> : vector<128xf32>
    %14 = vector.multi_reduction <add>, %13, %cst_7 [0] : vector<8x128xf32> to vector<128xf32>
    %15 = vector.shape_cast %14 : vector<128xf32> to vector<1x128xf32>
    %cst_8 = arith.constant 1.250000e-01 : f32
    %16 = vector.broadcast %cst_8 : f32 to vector<1x128xf32>
    %17 = arith.mulf %15, %16 : vector<1x128xf32>
    %c0_9 = arith.constant 0 : index
    %c0_10 = arith.constant 0 : index
    %18 = vector.load %arg3[%c0_9, %c0_10] : memref<1x128xf32, #tpu.memory_space<vmem>>, vector<1x128xf32>
    %cst_11 = arith.constant 9.99999974E-6 : f32
    %19 = vector.broadcast %cst_11 : f32 to vector<1x128xf32>
    %20 = arith.addf %17, %19 : vector<1x128xf32>
    %21 = math.rsqrt %20 : vector<1x128xf32>
    %22 = arith.mulf %18, %21 : vector<1x128xf32>
    %23 = vector.broadcast %22 : vector<1x128xf32> to vector<8x128xf32>
    %24 = arith.mulf %12, %23 : vector<8x128xf32>
    %c0_12 = arith.constant 0 : index
    %c0_13 = arith.constant 0 : index
    %25 = vector.load %arg4[%c0_12, %c0_13] : memref<1x128xf32, #tpu.memory_space<vmem>>, vector<1x128xf32>
    %26 = vector.broadcast %25 : vector<1x128xf32> to vector<8x128xf32>
    %27 = arith.addf %24, %26 : vector<8x128xf32>
    %cst_14 = arith.constant 0.000000e+00 : f32
    %28 = vector.broadcast %cst_14 : f32 to vector<8x128xf32>
    %29 = arith.maximumf %27, %28 : vector<8x128xf32>
    %30 = arith.truncf %29 : vector<8x128xf32> to vector<8x128xbf16>
    %c0_15 = arith.constant 0 : index
    %c0_16 = arith.constant 0 : index
    %31 = vector.load %arg5[%c0_15, %c0_16] : memref<128x8xbf16, #tpu.memory_space<vmem>>, vector<128x8xbf16>
    %cst_17 = arith.constant dense<0.000000e+00> : vector<8x8xf32>
    %32 = tpu.matmul %30, %31, %cst_17 {dimension_numbers = #tpu.dot_dimension_numbers<[1], [0], [0], [1], [0, 0, 1, 1], [], []>} : vector<8x128xbf16>, vector<128x8xbf16>, vector<8x8xf32> -> vector<8x8xf32>
    %c0_18 = arith.constant 0 : index
    %c0_19 = arith.constant 0 : index
    %33 = vector.load %arg6[%c0_18, %c0_19] : memref<1x8xf32, #tpu.memory_space<vmem>>, vector<1x8xf32>
    %34 = vector.broadcast %33 : vector<1x8xf32> to vector<8x8xf32>
    %35 = arith.addf %32, %34 : vector<8x8xf32>
    %c0_20 = arith.constant 0 : index
    %c0_21 = arith.constant 0 : index
    %36 = vector.load %arg7[%c0_20, %c0_21] : memref<8x8xf32, #tpu.memory_space<vmem>>, vector<8x8xf32>
    tpu.vector_store %arg7[%c0_20, %c0_21], %35 {strides = array<i32>} : memref<8x8xf32, #tpu.memory_space<vmem>>, vector<8x8xf32>,
    return
  }
}

</mosaic_0001>

<bundles_post_ra>
// kernel: mlp_forward.1
= control target key start
LH: loop header
LB: loop body
LE: loop exit
PB: predicated region body
PF: predicated region fallthrough
CT: control target
= control target key end

     0   :  { %v339_v1 = vmov 0.0   ;;  %vm45_vm0 = vcmask 130048   ;;  %vm340_vm1 = vmmov 0   ;;  %s427_s0 = inlined_call_operand.vmem [shape: f32[8,16], index: 0, kind: input, shape index: {}]   ;;  %s428_s1 = inlined_call_operand.vmem [shape: bf16[16,128], index: 1, kind: input, shape index: {}]   ;;  %s429_s2 = inlined_call_operand.vmem [shape: f32[1,128], index: 2, kind: input, shape index: {}]   ;;  %s430_s3 = inlined_call_operand.vmem [shape: f32[1,128], index: 3, kind: input, shape index: {}]   ;;  %s431_s4 = inlined_call_operand.vmem [shape: f32[1,128], index: 4, kind: input, shape index: {}]   ;;  %s432_s5 = inlined_call_operand.vmem [shape: bf16[128,8], index: 5, kind: input, shape index: {}]   ;;  %s433_s6 = inlined_call_operand.vmem [shape: f32[1,8], index: 6, kind: input, shape index: {}]   ;;  %s434_s7 = inlined_call_operand.hbm [shape: f32[8,8], index: 7, kind: output, shape index: {}]  }
   0x1   :  { %v306_v0 = vld [vmem:[%s428_s1] sm:$0xff]   ;;  %277 = vmatprep.subr.bf16.mxu0 %v339_v1  ;;  %283 = vmatprep.subr.bf16.mxu1 %v339_v1 }
   0x2   :  { %v28_v2 = vld [vmem:[%s427_s0] sm:$0xff]  ;;  %278 = vmatpush3.bf16.msra.mxu0 %v306_v0  ;;  %279 = vmatprep.mubr.msk.bf16.mxu0 %vm340_vm1, %v339_v1 }
   0x3   :  { %v29_v3 = vpack.c.bf16 %v28_v2, %v28_v2  ;;  %299 = vmatprep.mubr.msk.bf16.mxu1 %vm340_vm1, %v339_v1 }
   0x5   :  { %280 = vmatmul.mubr.msk.bf16.vlgmr.msra.gmra.mxu0 %vm45_vm0, %v29_v3 }
   0x6   :  { %12 = vsyncpa [#allocation3], 0  ;;  %v307_v4 = vld [vmem:[%s432_s5 + $0x38] sm:$0xff]   ;;  %v308_v5 = vld [vmem:[%s432_s5 + $0x30] sm:$0xff]   ;;  %v110_v35 = vlaneseq  ;;  %s341_s25 = smov [#allocation2]   ;;  %vm237_vm2 = vcmask 64512  }
   0x7   :  { %284 = vmatpush3.bf16.msra.mxu1 %v307_v4  ;;  %v309_v6 = vld [vmem:[%s432_s5 + $0x28] sm:$0xff]   ;;  %v310_v7 = vld [vmem:[%s432_s5 + $0x20] sm:$0xff]   ;;  %v311_v8 = vld [vmem:[%s432_s5 + $0x18] sm:$0xff]   ;;  %s245_s26 = sshll.u32 %s341_s25, 4  ;;  %s246_s26 = int_to_ptr.vmem [resolvable:$true] %s245_s26 }
   0x8   :  { %285 = vmatprep.subr.bf16.mxu1 %v339_v1  ;;  %v312_v9 = vld [vmem:[%s432_s5 + $0x10] sm:$0xff]   ;;  %v313_v10 = vld [vmem:[%s432_s5 + $0x8] sm:$0xff]   ;;  %v314_v11 = vld [vmem:[%s432_s5] sm:$0xff]   ;;  %v111_v36 = vshrl.u32 %v110_v35, 7  ;;  %p322_p1 = scmp.lt.s32.totalorder %s246_s26, %s246_s26 }
   0x9   :  { %v253_v12 = vld [vmem:[%s429_s2] ss:$0 sm:$0xff] }
   0xa   :  { %v105_v37 = vld [vmem:[%s430_s3] sm:$0x1]  ;;  %v112_v38 = vsub.s32 0, %v111_v36  ;;  %s317_s3 = scalar_lea.vmem %s246_s26, 128 }
   0xb   :  { %286 = vmatpush3.bf16.msra.mxu1 %v308_v5  ;;  %v256_v42 = vld [vmem:[%s431_s4] ss:$0 sm:$0xff]  ;;  %p318_p0 = scmp.ne.s32.totalorder %s246_s26, %s317_s3  ;;  %p323_p2 = scmp.lt.s32.totalorder %s317_s3, %s317_s3 }
   0xc   :  { %287 = vmatprep.subr.bf16.mxu1 %v339_v1  ;;  %v257_v47 = vld [vmem:[%s433_s6] ss:$0 sm:$0xff] }
   0xd   :  { %p324_p3 = por %p323_p2, %p322_p1 }
   0xf   :  { %288 = vmatpush3.bf16.msra.mxu1 %v309_v6  ;;  %p325_p4 = pnand %p324_p3, %p318_p0 }
  0x10   :  { %289 = vmatprep.subr.bf16.mxu1 %v339_v1 }
  0x13   :  { %290 = vmatpush3.bf16.msra.mxu1 %v310_v7 }
  0x14   :  { %291 = vmatprep.subr.bf16.mxu1 %v339_v1 }
  0x17   :  { %292 = vmatpush3.bf16.msra.mxu1 %v311_v8 }
  0x18   :  { %293 = vmatprep.subr.bf16.mxu1 %v339_v1 }
  0x1b   :  { %294 = vmatpush3.bf16.msra.mxu1 %v312_v9 }
  0x1c   :  { %295 = vmatprep.subr.bf16.mxu1 %v339_v1 }
  0x1f   :  { %296 = vmatpush3.bf16.msra.mxu1 %v313_v10 }
  0x20   :  { %297 = vmatprep.subr.bf16.mxu1 %v339_v1 }
  0x23   :  { %298 = vmatpush3.bf16.msra.mxu1 %v314_v11 }
  0xc5   :  { %v83_v13 = vpop.f32.mrf.mxu0 }
  0xc6   :  { %v84_v14 = vadd.f32 %v253_v12, %v83_v13 }
  0xc7   :  { %v281_v15 = vpop.f32.mrf.mxu0 }
  0xc8   :  { %v89_v16 = vrot.slane %v84_v14, 4 }
  0xc9   :  { %v86_v17 = vpop.f32.mrf.mxu0 }
  0xca   :  { %v90_v18 = vadd.f32 %v89_v16, %v84_v14 }
  0xcb   :  { %v282_v19 = vpop.f32.mrf.mxu0 }
  0xcc   :  { %v91_v20 = vrot.slane %v90_v18, 2 }
  0xce   :  { %v92_v21 = vadd.f32 %v91_v20, %v90_v18 }
  0xd0   :  { %v93_v22 = vrot.slane %v92_v21, 1 }
  0xd2   :  { %v94_v23 = vadd.f32 %v93_v22, %v92_v21 }
  0xd4   :  { %v95_v24 = vmul.f32 0.125, %v94_v23 }
  0xd6   :  { %v96_v25 = vsub.f32 %v84_v14, %v95_v24 }
  0xd8   :  { %v97_v26 = vmul.f32 %v96_v25, %v96_v25 }
  0xda   :  { %v98_v27 = vrot.slane %v97_v26, 4 }
  0xdc   :  { %v99_v28 = vadd.f32 %v98_v27, %v97_v26 }
  0xde   :  { %v100_v29 = vrot.slane %v99_v28, 2 }
  0xe0   :  { %v101_v30 = vadd.f32 %v100_v29, %v99_v28 }
  0xe2   :  { %v102_v31 = vrot.slane %v101_v30, 1 }
  0xe4   :  { %v103_v32 = vadd.f32 %v102_v31, %v101_v30 }
  0xe6   :  { %v104_v33 = vmul.f32 0.125, %v103_v32 }
  0xe8   :  { %v106_v34 = vadd.f32 1e-05, %v104_v33 }
  0xea   :  { %315 = vrsqrt.f32 %v106_v34 }
  0xf7   :  { %v316_v39 = vpop.eup %315 }
  0xf8   :  { %v108_v40 = vmul.f32 %v316_v39, %v105_v37 }
  0xfa   :  { %v113_v41 = vrot.slane %v108_v40, %v112_v38 }
  0xfc   :  { %v115_v43 = vmul.f32 %v113_v41, %v96_v25 }
  0xfe   :  { %v123_v44 = vadd.f32 %v256_v42, %v115_v43 }
 0x100   :  { %v124_v45 = vmax.f32 %v123_v44, 0.0 }
 0x102   :  { %v125_v46 = vpack.c.bf16 %v124_v45, %v124_v45 }
 0x104   :  { %300 = vmatmul.mubr.bf16.vlgmr.msra.gmra.mxu1 %v125_v46 }
 0x1c4   :  { %v231_v48 = vpop.f32.mrf.mxu1 }
 0x1c5   :  { %v232_v49 = vadd.f32 %v257_v47, %v231_v48 }
 0x1c6   :  { %v301_v50 = vpop.f32.mrf.mxu1 }
 0x1c7   :  { %238 = vst.msk [vmem:[#allocation2] sm:$0xff] %vm237_vm2, %v232_v49 }
 0x1c8   :  { %v234_v51 = vpop.f32.mrf.mxu1 }
 0x1c9   :  { %328 = shalt.err (!%p325_p4)
}
 0x1ca   :  { %248 = dma.vmem_to_hbm [thread:$0]  %s246_s26, 128, %s434_s7, [#allocation3]   ;;  %v302_v52 = vpop.f32.mrf.mxu1 }
 0x1cb   :  { %337 = dma.done.wait [#allocation3], 128  }
 0x1cc   :  { %338 = vsyncadd [#allocation3], 4294967168 }
 0x1cd   :  { %252 = vsyncpa [#allocation3], 1 }

</bundles_post_ra>
